<compile_context>
chip_gen: v7x
topology: tpu7x:2x2x1
jax: 0.10.0
libtpu: 0.0.40
codegen_flags: <defaults>
</compile_context>

<pallas_src>
import jax
import jax.numpy as jnp
from jax.experimental import pallas as pl
from jax.experimental.pallas import tpu as pltpu


def _state_transition_kernel(x_ref, params_ref, w2_ref, out_ref):
    # x_ref     : VMEM (B, 1)
    # params_ref: VMEM (5, 2H) rows: [w1_m | w1_v], [b1_m | b1_v],
    #             [b2_m | b2_v], [w_mu | w_var], [b_mu, b_var, 0, ...]
    # w2_ref    : VMEM (2H, 2H) block-diagonal [[W2_m, 0], [0, W2_v]]
    # out_ref   : VMEM (B, 2)   col 0 = mu, col 1 = var
    x = x_ref[...]                        # (B, 1)
    p = params_ref[...]                   # (5, 2H)
    B = x.shape[0]
    H = p.shape[1] // 2

    # ----- layer 1: Linear(1, H) + relu, both branches in one (B, 2H) slab --
    # K = 1 contraction -> VPU broadcast outer product (no MXU push/pop).
    h = jnp.maximum(x * p[0:1, :] + p[1:2, :], 0.0)              # (B, 2H)

    # ----- layer 2: Linear(H, H) + relu, both branches as ONE MXU matmul ----
    # Block-diagonal weight keeps the branches independent while issuing a
    # single vmatmul push/drain sequence.
    h = jnp.maximum(
        jnp.dot(h, w2_ref[...], preferred_element_type=jnp.float32)
        + p[2:3, :],
        0.0)                                                     # (B, 2H)

    # ----- heads: one VPU mul + one XLU cross-lane reduce for both heads ----
    prod = h * p[3:4, :]                                         # (B, 2H)
    heads = jnp.sum(prod.reshape(B, 2, H), axis=-1)              # (B, 2)
    heads = heads + p[4:5, 0:2]                                  # + [b_mu, b_var]

    mu = heads[:, 0:1]
    z = heads[:, 1:2]
    # var = log(1 + exp(z)), computed stably (torch-softplus-style threshold).
    var = jnp.where(z > 20.0, z, jnp.log1p(jnp.exp(jnp.minimum(z, 20.0))))
    out_ref[...] = jnp.concatenate([mu, var], axis=1).astype(out_ref.dtype)


def pack_state_transition_params(w1, b1, w2, b2, w_mu, b_mu,
                                 vw1, vb1, vw2, vb2, w_var, b_var):
    """Pack the 12 parameter tensors into 2 kernel operands.

    Call ONCE when parameters are created/updated, not per forward call.
    Weight layout is (in_features, out_features):
      w1, vw1: (1, H)   b1, vb1: (H,)
      w2, vw2: (H, H)   b2, vb2: (H,)
      w_mu, w_var: (H, 1); b_mu, b_var: scalar ()
    Returns (params (5, 2H) f32, w2_blockdiag (2H, 2H) f32).
    """
    H = w2.shape[0]
    f32 = jnp.float32
    bhead_row = jnp.zeros((2 * H,), f32).at[0].set(b_mu).at[1].set(b_var)
    params = jnp.stack(
        [
            jnp.concatenate([w1[0], vw1[0]]),
            jnp.concatenate([b1, vb1]),
            jnp.concatenate([b2, vb2]),
            jnp.concatenate([w_mu[:, 0], w_var[:, 0]]),
            bhead_row,
        ],
        axis=0,
    ).astype(f32)                                                # (5, 2H)

    w2_bd = jnp.zeros((2 * H, 2 * H), f32)
    w2_bd = w2_bd.at[:H, :H].set(w2.astype(f32))
    w2_bd = w2_bd.at[H:, H:].set(vw2.astype(f32))                # (2H, 2H)
    return params, w2_bd


@jax.jit
def state_transition_forward(x, params, w2_blockdiag):
    """Forward pass. `x`: (B, 1). Returns (mu, var), each (B, 1) float32."""
    B = x.shape[0]
    out = pl.pallas_call(
        _state_transition_kernel,
        out_shape=jax.ShapeDtypeStruct((B, 2), jnp.float32),
        # Gridless, whole-array operands resident in VMEM: no pipeline
        # bookkeeping for this tiny overhead-bound kernel.
        in_specs=[
            pl.BlockSpec(memory_space=pltpu.MemorySpace.VMEM),   # x (B, 1)
            pl.BlockSpec(memory_space=pltpu.MemorySpace.VMEM),   # params (5, 2H)
            pl.BlockSpec(memory_space=pltpu.MemorySpace.VMEM),   # w2 (2H, 2H)
        ],
        out_specs=pl.BlockSpec(memory_space=pltpu.MemorySpace.VMEM),
    )(x.astype(jnp.float32), params, w2_blockdiag)
    return out[:, 0:1], out[:, 1:2]


if __name__ == "__main__":
    key = jax.random.PRNGKey(0)
    B = 8     # batch of states
    H = 32    # num_hidden = (32, 32)

    keys = jax.random.split(key, 13)
    x = jax.random.normal(keys[0], (B, 1), dtype=jnp.float32)

    def xavier(k, fan_in, fan_out):
        lim = (6.0 / (fan_in + fan_out)) ** 0.5
        return jax.random.uniform(k, (fan_in, fan_out), minval=-lim, maxval=lim,
                                  dtype=jnp.float32)

    def bias(k, fan_in, n):
        lim = 1.0 / (fan_in ** 0.5)
        return jax.random.uniform(k, (n,), minval=-lim, maxval=lim,
                                  dtype=jnp.float32)

    # mean branch
    w1 = xavier(keys[1], 1, H);  b1 = bias(keys[2], 1, H)
    w2 = xavier(keys[3], H, H);  b2 = bias(keys[4], H, H)
    w_mu = xavier(keys[5], H, 1); b_mu = bias(keys[6], H, 1)[0]
    # variance branch
    vw1 = xavier(keys[7], 1, H);  vb1 = bias(keys[8], 1, H)
    vw2 = xavier(keys[9], H, H);  vb2 = bias(keys[10], H, H)
    w_var = xavier(keys[11], H, 1); b_var = bias(keys[12], H, 1)[0]

    # Pack once (outside the per-step path), then run the kernel.
    params, w2_bd = pack_state_transition_params(
        w1, b1, w2, b2, w_mu, b_mu, vw1, vb1, vw2, vb2, w_var, b_var)
    mu, var = state_transition_forward(x, params, w2_bd)
    jax.block_until_ready((mu, var))

    # Pure-JAX reference, same math as the torch forward.
    l_ref = jnp.maximum(x @ w1 + b1, 0.0)
    l_ref = jnp.maximum(l_ref @ w2 + b2, 0.0)
    mu_ref = l_ref @ w_mu + b_mu
    vl_ref = jnp.maximum(x @ vw1 + vb1, 0.0)
    vl_ref = jnp.maximum(vl_ref @ vw2 + vb2, 0.0)
    var_ref = jnp.log(1.0 + jnp.exp(vl_ref @ w_var + b_var))

    assert mu.shape == (B, 1) and var.shape == (B, 1)
    assert jnp.allclose(mu, mu_ref, atol=1e-5), "mu mismatch vs reference"
    assert jnp.allclose(var, var_ref, atol=1e-5), "var mismatch vs reference"

    print("KERNEL_OK")
</pallas_src>

<mosaic_0001>
module attributes {stable_mosaic.version = 11 : i64} {
  func.func @_state_transition_kernel(%arg0: memref<8x1xf32, #tpu.memory_space<vmem>>, %arg1: memref<5x64xf32, #tpu.memory_space<vmem>>, %arg2: memref<64x64xf32, #tpu.memory_space<vmem>>, %arg3: memref<8x2xf32, #tpu.memory_space<vmem>>) attributes {dimension_semantics = [], scalar_prefetch = 0 : i64, scratch_operands = 0 : i64, tpu.core_type = #tpu.core_type<tc>} {
    %c0 = arith.constant 0 : index
    %c0_0 = arith.constant 0 : index
    %0 = vector.load %arg0[%c0, %c0_0] : memref<8x1xf32, #tpu.memory_space<vmem>>, vector<8x1xf32>
    %c0_1 = arith.constant 0 : index
    %c0_2 = arith.constant 0 : index
    %1 = vector.load %arg1[%c0_1, %c0_2] : memref<5x64xf32, #tpu.memory_space<vmem>>, vector<5x64xf32>
    %2 = vector.extract_strided_slice %1 {offsets = [0, 0], sizes = [1, 64], strides = [1, 1]} : vector<5x64xf32> to vector<1x64xf32>
    %3 = vector.broadcast %0 : vector<8x1xf32> to vector<8x64xf32>
    %4 = vector.broadcast %2 : vector<1x64xf32> to vector<8x64xf32>
    %5 = arith.mulf %3, %4 : vector<8x64xf32>
    %6 = vector.extract_strided_slice %1 {offsets = [1, 0], sizes = [1, 64], strides = [1, 1]} : vector<5x64xf32> to vector<1x64xf32>
    %7 = vector.broadcast %6 : vector<1x64xf32> to vector<8x64xf32>
    %8 = arith.addf %5, %7 : vector<8x64xf32>
    %cst = arith.constant 0.000000e+00 : f32
    %9 = vector.broadcast %cst : f32 to vector<8x64xf32>
    %10 = arith.maximumf %8, %9 : vector<8x64xf32>
    %c0_3 = arith.constant 0 : index
    %c0_4 = arith.constant 0 : index
    %11 = vector.load %arg2[%c0_3, %c0_4] : memref<64x64xf32, #tpu.memory_space<vmem>>, vector<64x64xf32>
    %cst_5 = arith.constant dense<0.000000e+00> : vector<8x64xf32>
    %12 = tpu.matmul %10, %11, %cst_5 {dimension_numbers = #tpu.dot_dimension_numbers<[1], [0], [0], [1], [0, 0, 1, 1], [], []>} : vector<8x64xf32>, vector<64x64xf32>, vector<8x64xf32> -> vector<8x64xf32>
    %13 = vector.extract_strided_slice %1 {offsets = [2, 0], sizes = [1, 64], strides = [1, 1]} : vector<5x64xf32> to vector<1x64xf32>
    %14 = vector.broadcast %13 : vector<1x64xf32> to vector<8x64xf32>
    %15 = arith.addf %12, %14 : vector<8x64xf32>
    %cst_6 = arith.constant 0.000000e+00 : f32
    %16 = vector.broadcast %cst_6 : f32 to vector<8x64xf32>
    %17 = arith.maximumf %15, %16 : vector<8x64xf32>
    %18 = vector.extract_strided_slice %1 {offsets = [3, 0], sizes = [1, 64], strides = [1, 1]} : vector<5x64xf32> to vector<1x64xf32>
    %19 = vector.broadcast %18 : vector<1x64xf32> to vector<8x64xf32>
    %20 = arith.mulf %17, %19 : vector<8x64xf32>
    %21 = vector.shape_cast %20 : vector<8x64xf32> to vector<8x2x32xf32>
    %cst_7 = arith.constant dense<0.000000e+00> : vector<8x2xf32>
    %22 = vector.multi_reduction <add>, %21, %cst_7 [2] : vector<8x2x32xf32> to vector<8x2xf32>
    %23 = vector.extract_strided_slice %1 {offsets = [4, 0], sizes = [1, 2], strides = [1, 1]} : vector<5x64xf32> to vector<1x2xf32>
    %24 = vector.broadcast %23 : vector<1x2xf32> to vector<8x2xf32>
    %25 = arith.addf %22, %24 : vector<8x2xf32>
    %26 = vector.extract_strided_slice %25 {offsets = [0, 0], sizes = [8, 1], strides = [1, 1]} : vector<8x2xf32> to vector<8x1xf32>
    %27 = vector.extract_strided_slice %25 {offsets = [0, 1], sizes = [8, 1], strides = [1, 1]} : vector<8x2xf32> to vector<8x1xf32>
    %cst_8 = arith.constant 2.000000e+01 : f32
    %28 = vector.broadcast %cst_8 : f32 to vector<8x1xf32>
    %29 = arith.cmpf ogt, %27, %28 : vector<8x1xf32>
    %cst_9 = arith.constant 2.000000e+01 : f32
    %30 = vector.broadcast %cst_9 : f32 to vector<8x1xf32>
    %31 = arith.minimumf %27, %30 : vector<8x1xf32>
    %32 = math.exp %31 : vector<8x1xf32>
    %33 = math.log1p %32 : vector<8x1xf32>
    %34 = arith.select %29, %27, %33 : vector<8x1xi1>, vector<8x1xf32>
    %35 = tpu.concatenate %26, %34 in 1 : vector<8x1xf32>, vector<8x1xf32> -> vector<8x2xf32>
    %c0_10 = arith.constant 0 : index
    %c0_11 = arith.constant 0 : index
    %36 = vector.load %arg3[%c0_10, %c0_11] : memref<8x2xf32, #tpu.memory_space<vmem>>, vector<8x2xf32>
    tpu.vector_store %arg3[%c0_10, %c0_11], %35 {strides = array<i32>} : memref<8x2xf32, #tpu.memory_space<vmem>>, vector<8x2xf32>,
    return
  }
}

</mosaic_0001>

<bundles_post_ra>
// kernel: state_transition_forward.1
= control target key start
LH: loop header
LB: loop body
LE: loop exit
PB: predicated region body
PF: predicated region fallthrough
CT: control target
= control target key end

     0   :  { %8 = vsyncpa [#allocation3], 0  ;;  %s535_s12 = smov [#allocation2]   ;;  %s751_s0 = inlined_call_operand.vmem [shape: f32[8,1], index: 0, kind: input, shape index: {}]   ;;  %s752_s1 = inlined_call_operand.vmem [shape: f32[5,64], index: 1, kind: input, shape index: {}]   ;;  %s753_s2 = inlined_call_operand.hbm [shape: f32[64,64], index: 2, kind: input, shape index: {}]   ;;  %s754_s3 = inlined_call_operand.vmem [shape: f32[8,2], index: 3, kind: output, shape index: {}]  }
   0x1   :  { %s18_s13 = sshll.u32 %s535_s12, 4  ;;  %s511_s16 = scalar_lea.hbm %s753_s2, 1024  ;;  %s19_s13 = int_to_ptr.vmem [resolvable:$true] %s18_s13 }
   0x2   :  { %p512_p0 = scmp.ne.s32.totalorder %s753_s2, %s511_s16  ;;  %p515_p1 = scmp.lt.u32.totalorder %s511_s16, %s753_s2 }
   0x4   :  { %p517_p2 = pnand %p515_p1, %p512_p0 }
   0x6   :  { %520 = shalt.err (!%p517_p2)
}
   0x7   :  { %s521_s21 = scalar_lea.vmem %s19_s13, 1024  ;;  %p526_p4 = scmp.lt.s32.totalorder %s19_s13, %s19_s13 }
   0x8   :  { %p522_p3 = scmp.ne.s32.totalorder %s19_s13, %s521_s21  ;;  %p527_p5 = scmp.lt.s32.totalorder %s521_s21, %s521_s21 }
   0xa   :  { %p528_p6 = por %p527_p5, %p526_p4 }
   0xc   :  { %p529_p7 = pnand %p528_p6, %p522_p3 }
   0xe   :  { %532 = shalt.err (!%p529_p7)
}
   0xf   :  { %s536_s22 = smov 128   ;;  %s537_s23 = smov 8  }
  0x10   :  { %24 = dma.hbm_to_vmem [thread:$0]  %s753_s2, 1024, %s19_s13, [#allocation3], %s536_s22, %s536_s22, %s537_s23  }
  0x11   :  { %533 = dma.done.wait [#allocation3], 1024  }
  0x12   :  { %534 = vsyncadd [#allocation3], 4294966272  ;;  %v538_v0 = vmov 0   ;;  %v539_v1 = vmov 0.0|0.0   ;;  %v28_v2 = vld [vmem:[%s751_s0] sm:$0xff]  ;;  %v47_v4 = vld [vmem:[#allocation2 + $0x8] sm:$0xff]  ;;  %v35_v16 = vlaneseq }
  0x13   :  { %478 = vset.pattern.permute.xlu0 %v538_v0  ;;  %455 = vmatprep.subr.bf16.mxu0 %v539_v1  ;;  %v46_v3 = vld [vmem:[#allocation2] sm:$0xff]  ;;  %v48_v6 = vld [vmem:[#allocation2 + $0x10] sm:$0xff]  ;;  %v49_v7 = vld [vmem:[#allocation2 + $0x18] sm:$0xff]  ;;  %vm540_vm0 = vmmov 0   ;;  %v541_v11 = vmov 0.0   ;;  %vm58_vm1 = vcmask 523264  }
  0x14   :  { %32 = vperm.xlu0 %478, %v28_v2   ;;  %v456_v5 = vpack.c.bf16 %v47_v4, %v46_v3  ;;  %v459_v8 = vpack.c.bf16 %v49_v7, %v48_v6  ;;  %v50_v9 = vld [vmem:[#allocation2 + $0x20] sm:$0xff]  ;;  %v51_v10 = vld [vmem:[#allocation2 + $0x28] sm:$0xff]  ;;  %452 = vmatprep.mubr.msk.f32.mxu0 %vm540_vm0, %v541_v11  ;;  %v52_v13 = vld [vmem:[#allocation2 + $0x30] sm:$0xff]  ;;  %v582_v17 = vshrl.u32 %v35_v16, 7  ;;  %v543_v36 = vmov 1983009808  }
  0x15   :  { %v462_v12 = vpack.c.bf16 %v51_v10, %v50_v9  ;;  %v53_v14 = vld [vmem:[#allocation2 + $0x38] sm:$0xff]  ;;  %v588_v19 = vld [vmem:[%s752_s1] sm:$0x1f]  ;;  %s542_s1 = smov 96   ;;  %v144_v37 = vunpack.c.l.s4 %v543_v36  ;;  %v544_v39 = vmov 1934713408  }
  0x16   :  { %457 = vmatpush3.bf16.msra.mxu0 %v456_v5  ;;  %v465_v15 = vpack.c.bf16 %v53_v14, %v52_v13  ;;  %v37_v18 = vsub.s32 0, %v582_v17  ;;  %v42_v20 = vsub.s32 1, %v582_v17  ;;  %v56_v27 = vsub.s32 2, %v582_v17  ;;  %s545_s28 = smov 1  }
  0x17   :  { %458 = vmatprep.subr.bf16.mxu0 %v539_v1  ;;  %v135_v29 = vsub.s32 3, %v582_v17  ;;  %v145_v38 = vunpack.c.0.s8 %v144_v37  ;;  %v175_v40 = vunpack.c.l.s4 %v544_v39  ;;  %vm208_vm2 = vcmask 254976  }
  0x18   :  { %v38_v21 = vrot.slane %v588_v19, %v37_v18  ;;  %v43_v22 = vrot.slane %v588_v19, %v42_v20  ;;  %v57_v28 = vrot.slane %v588_v19, %v56_v27  ;;  %v235_v7 = vsub.s32 4, %v582_v17 }
  0x19   :  { %v136_v32 = vrot.slane %v588_v19, %v135_v29  ;;  %v148_v41 = vsub.s32 %v145_v38, %v582_v17  ;;  %v176_v42 = vunpack.c.0.s8 %v175_v40  ;;  %vm371_vm3 = vcmask 1041409  }
  0x1a   :  { %460 = vmatpush3.bf16.msra.mxu0 %v459_v8  ;;  %v236_v8 = vrot.slane %v588_v19, %v235_v7  ;;  %vm374_vm4 = vcmask 1042434   ;;  %vm377_vm5 = vcmask 1043459   ;;  %vm380_vm6 = vcmask 1044484  }
  0x1b   :  { %461 = vmatprep.subr.bf16.mxu0 %v539_v1  ;;  %v179_v46 = vsub.s32 %v176_v42, %v582_v17  ;;  %vm757_vm7 = vcmask 1045509   ;;  %vm756_vm8 = vcmask 1046534   ;;  %vm755_vm9 = vcmask 1047559  }
  0x1e   :  { %463 = vmatpush3.bf16.msra.mxu0 %v462_v12 }
  0x1f   :  { %464 = vmatprep.subr.bf16.mxu0 %v539_v1 }
  0x22   :  { %466 = vmatpush3.bf16.msra.mxu0 %v465_v15 }
  0x93   :  { %v33_v23 = vpop.permute.xlu0 %32 }
  0x94   :  { %v39_v24 = vmul.f32 %v38_v21, %v33_v23 }
  0x96   :  { %v44_v25 = vadd.f32 %v43_v22, %v39_v24 }
  0x98   :  { %v45_v26 = vmax.f32 %v44_v25, 0.0 }
  0x9a   :  { %453 = vmatmul.mubr.msk.f32.vlgmr.msra.gmra.mrb[0].mxu0 %vm58_vm1, %v45_v26 }
 0x16d   :  { %v128_v30 = vpop.f32.mrb[0].mxu0 }
 0x16e   :  { %v129_v31 = vadd.f32 %v128_v30, %v57_v28  ;;  %v454_v33 = vpop.f32.mrb[1].mxu0 }
 0x170   :  { %v132_v34 = vmax.f32 %v129_v31, 0.0 }
 0x172   :  { %v137_v35 = vmul.f32 %v136_v32, %v132_v34 }
 0x174   :  { %139 = vrot.lane.b32.xlu0 %v137_v35, %s542_s1  ;;  %v149_v44 = vrot.slane %v137_v35, %v148_v41  ;;  %v142_v50 = vcombine.high %v137_v35, %v541_v11 }
 0x176   :  { %v156_v57 = vrot.slane %v142_v50, %v148_v41 }
 0x1e6   :  { %v140_v43 = vpop.permute.xlu0 %139 }
 0x1e7   :  { %v164_v45 = vrot.slane %v140_v43, %v148_v41  ;;  %v157_v47 = vcombine.high %v140_v43, %v541_v11 }
 0x1e9   :  { %v173_v48 = vcombine.high %v149_v44, %v164_v45  ;;  %v172_v49 = vcombine.low %v149_v44, %v164_v45  ;;  %v171_v52 = vrot.slane %v157_v47, %v148_v41 }
 0x1eb   :  { %v180_v51 = vrot.slane %v172_v49, %v179_v46  ;;  %v187_v55 = vrot.slane %v173_v48, %v179_v46  ;;  %v188_v60 = vcombine.low %v156_v57, %v171_v52  ;;  %v189_v63 = vcombine.high %v156_v57, %v171_v52 }
 0x1ed   :  { %v209_v53 = vsel %vm208_vm2, %v180_v51, 0.0  ;;  %v204_v54 = vcombine.high %v180_v51, %v541_v11  ;;  %v215_v58 = vsel %vm208_vm2, %v187_v55, 0.0  ;;  %v205_v59 = vcombine.high %v187_v55, %v541_v11 }
 0x1ee   :  { %210 = vadd.xlane.f32.xlu1 %v209_v53  ;;  %v196_v62 = vrot.slane %v188_v60, %v179_v46  ;;  %v203_v1 = vrot.slane %v189_v63, %v179_v46 }
 0x1ef   :  { %v212_v56 = vsel %vm208_vm2, %v204_v54, 0.0  ;;  %v218_v61 = vsel %vm208_vm2, %v205_v59, 0.0 }
 0x1f0   :  { %213 = vadd.xlane.f32.xlu0 %v212_v56  ;;  %v221_v0 = vsel %vm208_vm2, %v196_v62, 0.0  ;;  %v227_v2 = vsel %vm208_vm2, %v203_v1, 0.0  ;;  %v206_v3 = vcombine.high %v196_v62, %v541_v11  ;;  %v207_v5 = vcombine.high %v203_v1, %v541_v11 }
 0x1f2   :  { %216 = vadd.xlane.f32.xlu1 %v215_v58  ;;  %v224_v4 = vsel %vm208_vm2, %v206_v3, 0.0  ;;  %v230_v6 = vsel %vm208_vm2, %v207_v5, 0.0 }
 0x1f6   :  { %219 = vadd.xlane.f32.xlu1 %v218_v61 }
 0x1fa   :  { %222 = vadd.xlane.f32.xlu1 %v221_v0 }
 0x1fe   :  { %228 = vadd.xlane.f32.xlu1 %v227_v2 }
 0x202   :  { %225 = vadd.xlane.f32.xlu1 %v224_v4 }
 0x206   :  { %231 = vadd.xlane.f32.xlu1 %v230_v6 }
 0x217   :  { %239 = vbcast.lane.b32.xlu1 %v236_v8, 256 }
 0x27b   :  { %v211_v9 = vpop.xlane.xlu1 %210 }
 0x27d   :  { %v214_v18 = vpop.xlane.xlu0 %213 }
 0x27f   :  { %v217_v10 = vpop.xlane.xlu1 %216 }
 0x283   :  { %v220_v12 = vpop.xlane.xlu1 %219 }
 0x287   :  { %v223_v13 = vpop.xlane.xlu1 %222 }
 0x28b   :  { %v229_v14 = vpop.xlane.xlu1 %228 }
 0x28f   :  { %v226_v15 = vpop.xlane.xlu1 %225 }
 0x293   :  { %v232_v16 = vpop.xlane.xlu1 %231 }
 0x297   :  { %v240_v20 = vpop.permute.xlu1 %239 }
 0x298   :  { %v615_v21 = vadd.f32 %v240_v20, %v211_v9  ;;  %v617_v11 = vadd.f32 %v240_v20, %v214_v18  ;;  %v619_v22 = vadd.f32 %v240_v20, %v217_v10  ;;  %v621_v23 = vadd.f32 %v240_v20, %v220_v12 }
 0x299   :  { %v623_v17 = vadd.f32 %v240_v20, %v223_v13  ;;  %v625_v19 = vadd.f32 %v240_v20, %v226_v15  ;;  %v627_v24 = vadd.f32 %v240_v20, %v229_v14  ;;  %v635_v34 = vadd.f32 %v240_v20, %v232_v16 }
 0x29a   :  { %v258_v25 = vmin.f32 %v615_v21, 20.0  ;;  %v259_v26 = vmin.f32 %v617_v11, 20.0  ;;  %v260_v27 = vmin.f32 %v619_v22, 20.0  ;;  %v261_v28 = vmin.f32 %v621_v23, 20.0 }
 0x29b   :  { %v262_v29 = vmin.f32 %v623_v17, 20.0  ;;  %v263_v30 = vmin.f32 %v625_v19, 20.0  ;;  %v264_v35 = vmin.f32 %v627_v24, 20.0  ;;  %v265_v39 = vmin.f32 %v635_v34, 20.0 }
 0x29c   :  { %v266_v31 = vmul.f32 1.442695, %v258_v25  ;;  %v268_v32 = vmul.f32 1.442695, %v259_v26  ;;  %v270_v33 = vmul.f32 1.442695, %v260_v27 }
 0x29d   :  { %v272_v36 = vmul.f32 1.442695, %v261_v28  ;;  %v274_v37 = vmul.f32 1.442695, %v262_v29  ;;  %v276_v38 = vmul.f32 1.442695, %v263_v30 }
 0x29e   :  { %479 = vpow2.f32 %v266_v31  ;;  %v278_v40 = vmul.f32 1.442695, %v264_v35  ;;  %v370_v41 = vrot.slane %v617_v11, 7  ;;  %v373_v42 = vrot.slane %v619_v22, 6 }
 0x29f   :  { %481 = vpow2.f32 %v268_v32  ;;  %v280_v43 = vmul.f32 1.442695, %v265_v39  ;;  %v376_v45 = vrot.slane %v621_v23, 5  ;;  %v379_v47 = vrot.slane %v623_v17, 4 }
 0x2a0   :  { %483 = vpow2.f32 %v270_v33  ;;  %v372_v44 = vsel %vm371_vm3, %v370_v41, %v615_v21  ;;  %v382_v49 = vrot.slane %v625_v19, 3  ;;  %v385_v51 = vrot.slane %v627_v24, 2 }
 0x2a1   :  { %485 = vpow2.f32 %v272_v36  ;;  %v375_v46 = vsel %vm374_vm4, %v373_v42, %v372_v44  ;;  %v388_v53 = vrot.slane %v635_v34, 1  ;;  %vm250_vm10 = vcmp.gt.f32.partialorder %v615_v21, 20.0 }
 0x2a2   :  { %487 = vpow2.f32 %v274_v37  ;;  %v378_v48 = vsel %vm377_vm5, %v376_v45, %v375_v46  ;;  %vm251_vm11 = vcmp.gt.f32.partialorder %v617_v11, 20.0  ;;  %vm252_vm12 = vcmp.gt.f32.partialorder %v619_v22, 20.0 }
 0x2a3   :  { %489 = vpow2.f32 %v276_v38  ;;  %v381_v50 = vsel %vm380_vm6, %v379_v47, %v378_v48  ;;  %vm253_vm14 = vcmp.gt.f32.partialorder %v621_v23, 20.0  ;;  %vm254_vm1 = vcmp.gt.f32.partialorder %v623_v17, 20.0 }
 0x2a4   :  { %491 = vpow2.f32 %v278_v40  ;;  %v384_v52 = vsel %vm757_vm7, %v382_v49, %v381_v50  ;;  %vm256_vm7 = vcmp.gt.f32.partialorder %v627_v24, 20.0 }
 0x2a5   :  { %493 = vpow2.f32 %v280_v43  ;;  %v387_v55 = vsel %vm756_vm8, %v385_v51, %v384_v52 }
 0x2a6   :  { %v654_v58 = vsel %vm755_vm9, %v388_v53, %v387_v55  ;;  %vm255_vm9 = vcmp.gt.f32.partialorder %v625_v19, 20.0 }
 0x2a8   :  { %v480_v54 = vpop.eup %479 }
 0x2a9   :  { %v482_v56 = vpop.eup %481  ;;  %v282_v57 = vadd.f32 1.0, %v480_v54  ;;  %v285_v0 = vmul.f32 -0.5, %v480_v54  ;;  %v288_v6 = vand.u32 2147483647, %v480_v54 }
 0x2aa   :  { %v484_v59 = vpop.eup %483  ;;  %v291_v60 = vadd.f32 1.0, %v482_v56  ;;  %v294_v1 = vmul.f32 -0.5, %v482_v56  ;;  %v297_v10 = vand.u32 2147483647, %v482_v56 }
 0x2ab   :  { %v486_v61 = vpop.eup %485  ;;  %495 = vlog2.f32 %v282_v57  ;;  %v300_v62 = vadd.f32 1.0, %v484_v59  ;;  %v303_v4 = vmul.f32 -0.5, %v484_v59  ;;  %v286_v9 = vadd.f32 1.0, %v285_v0 }
 0x2ac   :  { %v656_v63 = vpop.eup %487  ;;  %497 = vlog2.f32 %v291_v60  ;;  %v309_v2 = vadd.f32 1.0, %v486_v61  ;;  %v312_v7 = vmul.f32 -0.5, %v486_v61  ;;  %v295_v13 = vadd.f32 1.0, %v294_v1 }
 0x2ad   :  { %499 = vlog2.f32 %v300_v62  ;;  %v658_v3 = vpop.eup %489  ;;  %v318_v8 = vadd.f32 1.0, %v656_v63  ;;  %v306_v14 = vand.u32 2147483647, %v484_v59  ;;  %v304_v16 = vadd.f32 1.0, %v303_v4 }
 0x2ae   :  { %v660_v5 = vpop.eup %491  ;;  %501 = vlog2.f32 %v309_v2  ;;  %v327_v15 = vadd.f32 1.0, %v658_v3  ;;  %v321_v18 = vmul.f32 -0.5, %v656_v63  ;;  %vm671_vm13 = vcmp.lt.f32.partialorder %v288_v6, 0.0004427343 }
 0x2af   :  { %v664_v12 = vpop.eup %493  ;;  %503 = vlog2.f32 %v318_v8  ;;  %v336_v20 = vadd.f32 1.0, %v660_v5  ;;  %v313_v26 = vadd.f32 1.0, %v312_v7  ;;  %v315_v27 = vand.u32 2147483647, %v486_v61 }
 0x2b0   :  { %505 = vlog2.f32 %v327_v15  ;;  %vm676_vm15 = vcmp.lt.f32.partialorder %v297_v10, 0.0004427343  ;;  %v324_v29 = vand.u32 2147483647, %v656_v63  ;;  %v345_v30 = vadd.f32 1.0, %v664_v12 }
 0x2b1   :  { %507 = vlog2.f32 %v336_v20  ;;  %v287_v32 = vmul.f32 %v480_v54, %v286_v9  ;;  %v296_v33 = vmul.f32 %v482_v56, %v295_v13  ;;  %vm682_vm0 = vcmp.lt.f32.partialorder %v306_v14, 0.0004427343 }
 0x2b2   :  { %v330_v36 = vmul.f32 -0.5, %v658_v3  ;;  %v305_v39 = vmul.f32 %v484_v59, %v304_v16  ;;  %v322_v40 = vadd.f32 1.0, %v321_v18  ;;  %509 = vlog2.f32 %v345_v30 }
 0x2b3   :  { %v314_v43 = vmul.f32 %v486_v61, %v313_v26  ;;  %vm688_vm2 = vcmp.lt.f32.partialorder %v315_v27, 0.0004427343  ;;  %v339_v45 = vmul.f32 -0.5, %v660_v5  ;;  %vm696_vm8 = vcmp.lt.f32.partialorder %v324_v29, 0.0004427343 }
 0x2b4   :  { %v333_v49 = vand.u32 2147483647, %v658_v3  ;;  %v331_v52 = vadd.f32 1.0, %v330_v36  ;;  %v348_v53 = vmul.f32 -0.5, %v664_v12  ;;  %v323_v57 = vmul.f32 %v656_v63, %v322_v40 }
 0x2b5   :  { %v496_v31 = vpop.eup %495  ;;  %v340_v61 = vadd.f32 1.0, %v339_v45  ;;  %v342_v62 = vand.u32 2147483647, %v660_v5  ;;  %v351_v9 = vand.u32 2147483647, %v664_v12 }
 0x2b6   :  { %v498_v37 = vpop.eup %497  ;;  %v284_v38 = vmul.f32 0.6931472, %v496_v31  ;;  %v332_v7 = vmul.f32 %v658_v3, %v331_v52  ;;  %v349_v8 = vadd.f32 1.0, %v348_v53 }
 0x2b7   :  { %v500_v41 = vpop.eup %499  ;;  %v293_v42 = vmul.f32 0.6931472, %v498_v37  ;;  %v341_v18 = vmul.f32 %v660_v5, %v340_v61 }
 0x2b8   :  { %v290_v46 = vsel %vm671_vm13, %v287_v32, %v284_v38  ;;  %v302_v47 = vmul.f32 0.6931472, %v500_v41  ;;  %v502_v50 = vpop.eup %501  ;;  %v350_v29 = vmul.f32 %v664_v12, %v349_v8 }
 0x2b9   :  { %v299_v51 = vsel %vm676_vm15, %v296_v33, %v293_v42  ;;  %v354_v54 = vsel %vm250_vm10, %v615_v21, %v290_v46  ;;  %v311_v56 = vmul.f32 0.6931472, %v502_v50  ;;  %v504_v60 = vpop.eup %503  ;;  %vm343_vm10 = vcmp.lt.f32.partialorder %v342_v62, 0.0004427343 }
 0x2ba   :  { %v308_v55 = vsel %vm682_vm0, %v305_v39, %v302_v47  ;;  %v400_v59 = vrot.slane %v354_v54, 1  ;;  %v355_v0 = vsel %vm251_vm11, %v617_v11, %v299_v51  ;;  %v320_v2 = vmul.f32 0.6931472, %v504_v60  ;;  %v506_v6 = vpop.eup %505 }
 0x2bb   :  { %v356_v1 = vsel %vm252_vm12, %v619_v22, %v308_v55  ;;  %v317_v21 = vsel %vm688_vm2, %v314_v43, %v311_v56  ;;  %v508_v10 = vpop.eup %507  ;;  %v329_v13 = vmul.f32 0.6931472, %v506_v6  ;;  %vm769_vm11 = vcmask 1046534  }
 0x2bc   :  { %v401_v4 = vsel %vm371_vm3, %v355_v0, %v400_v59  ;;  %v402_v63 = vrot.slane %v356_v1, 7  ;;  %v357_v11 = vsel %vm253_vm14, %v621_v23, %v317_v21  ;;  %v326_v22 = vsel %vm696_vm8, %v323_v57, %v320_v2  ;;  %v510_v20 = vpop.eup %509 }
 0x2bd   :  { %v404_v15 = vrot.slane %v357_v11, 6  ;;  %vm334_vm3 = vcmp.lt.f32.partialorder %v333_v49, 0.0004427343  ;;  %v338_v16 = vmul.f32 0.6931472, %v508_v10  ;;  %v358_v3 = vsel %vm254_vm1, %v623_v17, %v326_v22 }
 0x2be   :  { %v403_v14 = vsel %vm374_vm4, %v402_v63, %v401_v4  ;;  %v335_v25 = vsel %vm334_vm3, %v332_v7, %v329_v13  ;;  %v406_v26 = vrot.slane %v358_v3, 5  ;;  %v347_v28 = vmul.f32 0.6931472, %v510_v20 }
 0x2bf   :  { %v405_v23 = vsel %vm377_vm5, %v404_v15, %v403_v14  ;;  %v344_v27 = vsel %vm343_vm10, %v341_v18, %v338_v16  ;;  %v359_v30 = vsel %vm255_vm9, %v625_v19, %v335_v25  ;;  %vm352_vm4 = vcmp.lt.f32.partialorder %v351_v9, 0.0004427343 }
 0x2c0   :  { %v360_v5 = vsel %vm256_vm7, %v627_v24, %v344_v27  ;;  %v407_v17 = vsel %vm380_vm6, %v406_v26, %v405_v23  ;;  %v408_v31 = vrot.slane %v359_v30, 4  ;;  %vm257_vm8 = vcmp.gt.f32.partialorder %v635_v34, 20.0 }
 0x2c1   :  { %v353_v32 = vsel %vm352_vm4, %v350_v29, %v347_v28  ;;  %v410_v33 = vrot.slane %v360_v5, 3  ;;  %vm768_vm5 = vcmask 1045509   ;;  %vm770_vm9 = vcmask 1047559  }
 0x2c2   :  { %v361_v35 = vsel %vm257_vm8, %v635_v34, %v353_v32  ;;  %v409_v12 = vsel %vm768_vm5, %v408_v31, %v407_v17  ;;  %vm417_vm12 = vcmask 7168   ;;  %vm419_vm7 = vcmask 15360  }
 0x2c3   :  { %v411_v36 = vsel %vm769_vm11, %v410_v33, %v409_v12  ;;  %v412_v37 = vrot.slane %v361_v35, 2 }
 0x2c5   :  { %v413_v19 = vsel %vm770_vm9, %v412_v37, %v411_v36 }
 0x2c6   :  { %414 = vrot.lane.b32.xlu0 %v413_v19, %s545_s28 }
 0x338   :  { %v415_v24 = vpop.permute.xlu0 %414 }
 0x339   :  { %v418_v38 = vsel %vm417_vm12, %v654_v58, %v415_v24 }
 0x33a   :  { %420 = vst.msk [vmem:[%s754_s3] sm:$0xff] %vm419_vm7, %v418_v38 }
 0x33b   :  { %425 = vsyncpa [#allocation3], 1 }

</bundles_post_ra>
